<compile_context>
chip_gen: v5e
topology: v5e:2x2
jax: 0.10.0
libtpu: 0.0.40
codegen_flags: <defaults>
</compile_context>

<pallas_src>
import jax
import jax.numpy as jnp
from jax.experimental import pallas as pl
from jax.experimental.pallas import tpu as pltpu


def _cdiv(a, b):
    return -(-a // b)


def _round_up(x, m):
    return _cdiv(x, m) * m


def _vmem_capacity_bytes():
    try:
        return int(pltpu.get_tpu_info().vmem_capacity_bytes)
    except Exception:
        return 128 << 20  # v5e/v6e physical; only used if the query is unavailable


def _num_tensorcores():
    """Heuristic TC-per-chip count (megacore sharding hint only, not correctness)."""
    try:
        kind = jax.devices()[0].device_kind.lower()
    except Exception:
        return 1
    if ("v4" in kind) or ("v5p" in kind) or ("v7" in kind) or ("tpu7" in kind) or ("7x" in kind):
        return 2
    return 1


def _batch_tiling(batch, bm_cap, num_cores):
    """Pick (bm, n_steps): fat tiles / few grid steps. On megacore, large batches
    get an even grid with >= 2 steps per core; tiny batches round to 16 rows."""
    bm_cap = max(16, (bm_cap // 16) * 16)
    if batch < 32:
        bm = min(_round_up(batch, 16), bm_cap)
        return bm, _cdiv(batch, bm)
    n = _cdiv(batch, bm_cap)
    if num_cores > 1:
        if batch >= 2 * num_cores * 128:     # "large" batch: >= 2 fat steps per core
            n = max(n, 2 * num_cores)
        if n > 1:
            n = _round_up(n, num_cores)      # balanced (even) grid across cores
    bm = _round_up(_cdiv(batch, n), 16)
    return bm, n


# --------------------------- kernels ---------------------------

def _fused_kernel(x_ref, w1_ref, b1_ref, w2_ref, b2_ref, w3_ref, b3_ref, o_ref):
    # Layer 1: (bm, Dp) f32 -> bf16 on the fly; MXU with f32 accumulation.
    h = jnp.dot(x_ref[...].astype(jnp.bfloat16), w1_ref[...],
                preferred_element_type=jnp.float32)
    h = jnp.maximum(h + b1_ref[...], 0.0).astype(jnp.bfloat16)
    # Layer 2: (bm, 512) @ (512, 256)
    h = jnp.dot(h, w2_ref[...], preferred_element_type=jnp.float32)
    h = jnp.maximum(h + b2_ref[...], 0.0).astype(jnp.bfloat16)
    # Layer 3: (bm, 256) @ (256, Lp), lane-padded output.
    out = jnp.dot(h, w3_ref[...], preferred_element_type=jnp.float32) + b3_ref[...]
    o_ref[...] = out.astype(o_ref.dtype)


def _ktiled_kernel(x_ref, w1_ref, b1_ref, w2_ref, b2_ref, w3_ref, b3_ref, o_ref,
                   acc_ref):
    # Layer-1 contraction tiled over D (grid axis 1, "arbitrary"); f32 accumulator.
    k = pl.program_id(1)

    @pl.when(k == 0)
    def _():
        acc_ref[...] = jnp.zeros_like(acc_ref)

    acc_ref[...] += jnp.dot(x_ref[...], w1_ref[...],
                            preferred_element_type=jnp.float32)

    @pl.when(k == pl.num_programs(1) - 1)
    def _():
        h = jnp.maximum(acc_ref[...] + b1_ref[...], 0.0).astype(jnp.bfloat16)
        h = jnp.dot(h, w2_ref[...], preferred_element_type=jnp.float32)
        h = jnp.maximum(h + b2_ref[...], 0.0).astype(jnp.bfloat16)
        out = jnp.dot(h, w3_ref[...], preferred_element_type=jnp.float32) + b3_ref[...]
        o_ref[...] = out.astype(o_ref.dtype)


# --------------------------- builders ---------------------------

def _resident_spec(shape):
    # Constant index_map: the pipeline copies the block once and keeps it resident.
    return pl.BlockSpec(shape, lambda *_: (0,) * len(shape))


def _build_fused(bm, Bp, Dp, Lp, out_dtype, vmem_limit, cost):
    return pl.pallas_call(
        _fused_kernel,
        out_shape=jax.ShapeDtypeStruct((Bp, Lp), out_dtype),
        grid_spec=pltpu.PrefetchScalarGridSpec(
            num_scalar_prefetch=0,
            grid=(Bp // bm,),
            in_specs=[
                pl.BlockSpec((bm, Dp), lambda i: (i, 0)),   # x tile (f32)
                _resident_spec((Dp, 512)),                  # w1 (bf16)
                _resident_spec((1, 512)),                   # b1 (f32)
                _resident_spec((512, 256)),                 # w2 (bf16)
                _resident_spec((1, 256)),                   # b2 (f32)
                _resident_spec((256, Lp)),                  # w3 (bf16, lane-padded)
                _resident_spec((1, Lp)),                    # b3 (f32, lane-padded)
            ],
            out_specs=pl.BlockSpec((bm, Lp), lambda i: (i, 0)),
        ),
        compiler_params=pltpu.CompilerParams(
            dimension_semantics=("parallel",),
            vmem_limit_bytes=vmem_limit,
        ),
        cost_estimate=cost,
    )


def _build_ktiled(bm, Bp, tk, Dk, Lp, out_dtype, vmem_limit, cost):
    return pl.pallas_call(
        _ktiled_kernel,
        out_shape=jax.ShapeDtypeStruct((Bp, Lp), out_dtype),
        grid_spec=pltpu.PrefetchScalarGridSpec(
            num_scalar_prefetch=0,
            grid=(Bp // bm, Dk // tk),
            in_specs=[
                pl.BlockSpec((bm, tk), lambda i, k: (i, k)),   # x K-slab (bf16)
                pl.BlockSpec((tk, 512), lambda i, k: (k, 0)),  # w1 K-slab (bf16)
                _resident_spec((1, 512)),                      # b1
                _resident_spec((512, 256)),                    # w2
                _resident_spec((1, 256)),                      # b2
                _resident_spec((256, Lp)),                     # w3
                _resident_spec((1, Lp)),                       # b3
            ],
            out_specs=pl.BlockSpec((bm, Lp), lambda i, k: (i, 0)),
            scratch_shapes=[pltpu.VMEM((bm, 512), jnp.float32)],
        ),
        compiler_params=pltpu.CompilerParams(
            dimension_semantics=("parallel", "arbitrary"),
            vmem_limit_bytes=vmem_limit,
        ),
        cost_estimate=cost,
    )


# --------------------------- wrapper ---------------------------

def mlp_encoder(x, params, *, num_points, latent_size, bm=None, tk=None,
                force_k_tiling=False):
    """x: (B, num_points, 3). Returns (B, latent_size) in x.dtype."""
    w1, b1, w2, b2, w3, b3 = params
    B = x.shape[0]
    D = num_points * 3
    Dp = _round_up(D, 128)                 # only pads when D % 128 != 0 (small D)
    Lp = _round_up(latent_size, 128)       # lane-dense output -> unmasked stores
    out_dtype = x.dtype
    out_it = jnp.dtype(out_dtype).itemsize

    capacity = _vmem_capacity_bytes()
    budget = int(capacity * 0.8)           # ~80% of physical per-core VMEM
    num_cores = _num_tensorcores()

    flops = 2 * B * (D * 512 + 512 * 256 + 256 * latent_size)
    bytes_accessed = (B * Dp * x.dtype.itemsize
                      + 2 * (Dp * 512 + 512 * 256 + 256 * Lp)
                      + B * Lp * out_it)
    cost = pl.CostEstimate(flops=flops, transcendentals=0,
                           bytes_accessed=bytes_accessed)

    x2d = x.reshape(B, D)

    # Fused-path VMEM need: bf16 weights + f32 biases (x2 pipeline buffers; copied
    # only once thanks to the constant index_map), double-buffered f32 x / out
    # tiles, activation temporaries, headroom.
    fused_fixed = (4 * (Dp * 512 + 512 * 256 + 256 * Lp)
                   + 8 * (512 + 256 + Lp)
                   + (2 << 20))
    fused_per_row = 2 * Dp * 4 + 2 * Lp * out_it + 10 * 1024
    bm_fit = (budget - fused_fixed) // fused_per_row
    use_fused = (not force_k_tiling) and bm_fit >= 16

    if use_fused:
        if bm is None:
            bm, n = _batch_tiling(B, min(512, int(bm_fit)), num_cores)
        else:
            n = _cdiv(B, bm)
        Bp = bm * n
        if Bp != B or Dp != D:
            x2d = jnp.pad(x2d, ((0, Bp - B), (0, Dp - D)))   # no dtype cast: kernel casts
        args = (
            x2d,
            jnp.pad(w1, ((0, Dp - D), (0, 0))).astype(jnp.bfloat16),
            b1.astype(jnp.float32),
            w2.astype(jnp.bfloat16),
            b2.astype(jnp.float32),
            jnp.pad(w3, ((0, 0), (0, Lp - latent_size))).astype(jnp.bfloat16),
            jnp.pad(b3, ((0, 0), (0, Lp - latent_size))).astype(jnp.float32),
        )
        need = fused_fixed + bm * fused_per_row
        vmem_limit = int(min(budget, max(need, 32 << 20)))
        out = _build_fused(bm, Bp, Dp, Lp, out_dtype, vmem_limit, cost)(*args)
    else:
        # K-tiled fallback: w1 streamed in (tk, 512) slabs, small weights resident,
        # layer-1 accumulated in f32 VMEM scratch, layers 2/3 in the final K step.
        kt_fixed = 4 * (512 * 256 + 256 * Lp) + 8 * (512 + 256 + Lp) + (2 << 20)
        if bm is None:
            bm, n = _batch_tiling(B, 256, num_cores)
        else:
            n = _cdiv(B, bm)
        Bp = bm * n
        per_bm = 512 * 4 + 2 * Lp * out_it + 8 * 1024       # acc + out + temporaries
        if tk is None:
            per_k = 2 * 512 * 2 + 2 * bm * 2                 # w1 + x slabs, bf16, x2 bufs
            avail = max(budget - kt_fixed - bm * per_bm, 4 << 20)
            tk = max(128, min(4096, (avail // per_k) // 128 * 128))
        Dk = _round_up(D, tk)
        # TODO(synk): support a ragged last K tile to avoid materializing the padded
        # bf16 copy of x when D is not a multiple of tk.
        x_kt = jnp.pad(x2d, ((0, Bp - B), (0, Dk - D))).astype(jnp.bfloat16)
        args = (
            x_kt,
            jnp.pad(w1, ((0, Dk - D), (0, 0))).astype(jnp.bfloat16),
            b1.astype(jnp.float32),
            w2.astype(jnp.bfloat16),
            b2.astype(jnp.float32),
            jnp.pad(w3, ((0, 0), (0, Lp - latent_size))).astype(jnp.bfloat16),
            jnp.pad(b3, ((0, 0), (0, Lp - latent_size))).astype(jnp.float32),
        )
        need = kt_fixed + bm * per_bm + tk * (2 * 512 * 2 + 2 * bm * 2)
        vmem_limit = int(min(budget, max(need, 32 << 20)))
        out = _build_ktiled(bm, Bp, tk, Dk, Lp, out_dtype, vmem_limit, cost)(*args)

    return out[:B, :latent_size]


def init_params(key, num_points, latent_size):
    """PyTorch nn.Linear-style init (uniform +-1/sqrt(fan_in)); weights stored
    as (in, out) == W.T, biases as (1, out)."""
    D = num_points * 3
    dims = [(D, 512), (512, 256), (256, latent_size)]
    params = []
    for fan_in, fan_out in dims:
        key, kw, kb = jax.random.split(key, 3)
        bound = 1.0 / jnp.sqrt(float(fan_in))
        w = jax.random.uniform(kw, (fan_in, fan_out), jnp.float32, -bound, bound)
        b = jax.random.uniform(kb, (1, fan_out), jnp.float32, -bound, bound)
        params.extend([w, b])
    return tuple(params)


if __name__ == "__main__":
    num_points = 64
    latent_size = 32
    B = 8

    key = jax.random.PRNGKey(0)
    key, kx = jax.random.split(key)
    x = jax.random.normal(kx, (B, num_points, 3), dtype=jnp.float32)
    params = init_params(key, num_points, latent_size)

    # Fused (all-weights-resident) path.
    out = mlp_encoder(x, params, num_points=num_points, latent_size=latent_size)
    out = jax.block_until_ready(out)

    # Exercise the K-tiled (large-num_points) path at small scale too.
    out_kt = mlp_encoder(x, params, num_points=num_points, latent_size=latent_size,
                         force_k_tiling=True, tk=128)
    out_kt = jax.block_until_ready(out_kt)

    # Pure-JAX reference with the same bf16-weights / f32-accumulate recipe.
    w1, b1, w2, b2, w3, b3 = params
    h = x.reshape(B, num_points * 3).astype(jnp.bfloat16)
    h = jnp.dot(h, w1.astype(jnp.bfloat16), preferred_element_type=jnp.float32) + b1
    h = jnp.maximum(h, 0.0).astype(jnp.bfloat16)
    h = jnp.dot(h, w2.astype(jnp.bfloat16), preferred_element_type=jnp.float32) + b2
    h = jnp.maximum(h, 0.0).astype(jnp.bfloat16)
    ref = jnp.dot(h, w3.astype(jnp.bfloat16), preferred_element_type=jnp.float32) + b3

    assert out.shape == (B, latent_size)
    assert out_kt.shape == (B, latent_size)
    err = float(jnp.max(jnp.abs(out - ref)))
    err_kt = float(jnp.max(jnp.abs(out_kt - ref)))
    assert jnp.allclose(out, ref, atol=2e-2, rtol=2e-2), f"fused max abs err {err}"
    assert jnp.allclose(out_kt, ref, atol=2e-2, rtol=2e-2), f"k-tiled max abs err {err_kt}"

    print("KERNEL_OK")
</pallas_src>

<mosaic_0001>
module attributes {stable_mosaic.version = 11 : i64} {
  func.func @_fused_kernel(%arg0: i32, %arg1: memref<16x256xf32, #tpu.memory_space<vmem>>, %arg2: memref<256x512xbf16, #tpu.memory_space<vmem>>, %arg3: memref<1x512xf32, #tpu.memory_space<vmem>>, %arg4: memref<512x256xbf16, #tpu.memory_space<vmem>>, %arg5: memref<1x256xf32, #tpu.memory_space<vmem>>, %arg6: memref<256x128xbf16, #tpu.memory_space<vmem>>, %arg7: memref<1x128xf32, #tpu.memory_space<vmem>>, %arg8: memref<16x128xf32, #tpu.memory_space<vmem>>) attributes {dimension_semantics = [#tpu.dimension_semantics<parallel>], iteration_bounds = array<i64: 1>, scalar_prefetch = 0 : i64, scratch_operands = 0 : i64, tpu.core_type = #tpu.core_type<tc>, window_params = [{transform_indices = @transform_0, window_bounds = array<i64: 16, 256>}, {pipeline_mode = #tpu.pipeline_mode<synchronous>, transform_indices = @transform_1, window_bounds = array<i64: 256, 512>}, {pipeline_mode = #tpu.pipeline_mode<synchronous>, transform_indices = @transform_2, window_bounds = array<i64: 1, 512>}, {pipeline_mode = #tpu.pipeline_mode<synchronous>, transform_indices = @transform_3, window_bounds = array<i64: 512, 256>}, {pipeline_mode = #tpu.pipeline_mode<synchronous>, transform_indices = @transform_4, window_bounds = array<i64: 1, 256>}, {pipeline_mode = #tpu.pipeline_mode<synchronous>, transform_indices = @transform_5, window_bounds = array<i64: 256, 128>}, {pipeline_mode = #tpu.pipeline_mode<synchronous>, transform_indices = @transform_6, window_bounds = array<i64: 1, 128>}, {transform_indices = @transform_7, window_bounds = array<i64: 16, 128>}]} {
    %c0 = arith.constant 0 : index
    %c0_0 = arith.constant 0 : index
    %0 = vector.load %arg1[%c0, %c0_0] : memref<16x256xf32, #tpu.memory_space<vmem>>, vector<16x256xf32>
    %1 = arith.truncf %0 : vector<16x256xf32> to vector<16x256xbf16>
    %c0_1 = arith.constant 0 : index
    %c0_2 = arith.constant 0 : index
    %2 = vector.load %arg2[%c0_1, %c0_2] : memref<256x512xbf16, #tpu.memory_space<vmem>>, vector<256x512xbf16>
    %cst = arith.constant dense<0.000000e+00> : vector<16x512xf32>
    %3 = tpu.matmul %1, %2, %cst {dimension_numbers = #tpu.dot_dimension_numbers<[1], [0], [0], [1], [0, 0, 1, 1], [], []>} : vector<16x256xbf16>, vector<256x512xbf16>, vector<16x512xf32> -> vector<16x512xf32>
    %c0_3 = arith.constant 0 : index
    %c0_4 = arith.constant 0 : index
    %4 = vector.load %arg3[%c0_3, %c0_4] : memref<1x512xf32, #tpu.memory_space<vmem>>, vector<1x512xf32>
    %5 = vector.broadcast %4 : vector<1x512xf32> to vector<16x512xf32>
    %6 = arith.addf %3, %5 : vector<16x512xf32>
    %cst_5 = arith.constant 0.000000e+00 : f32
    %7 = vector.broadcast %cst_5 : f32 to vector<16x512xf32>
    %8 = arith.maximumf %6, %7 : vector<16x512xf32>
    %9 = arith.truncf %8 : vector<16x512xf32> to vector<16x512xbf16>
    %c0_6 = arith.constant 0 : index
    %c0_7 = arith.constant 0 : index
    %10 = vector.load %arg4[%c0_6, %c0_7] : memref<512x256xbf16, #tpu.memory_space<vmem>>, vector<512x256xbf16>
    %cst_8 = arith.constant dense<0.000000e+00> : vector<16x256xf32>
    %11 = tpu.matmul %9, %10, %cst_8 {dimension_numbers = #tpu.dot_dimension_numbers<[1], [0], [0], [1], [0, 0, 1, 1], [], []>} : vector<16x512xbf16>, vector<512x256xbf16>, vector<16x256xf32> -> vector<16x256xf32>
    %c0_9 = arith.constant 0 : index
    %c0_10 = arith.constant 0 : index
    %12 = vector.load %arg5[%c0_9, %c0_10] : memref<1x256xf32, #tpu.memory_space<vmem>>, vector<1x256xf32>
    %13 = vector.broadcast %12 : vector<1x256xf32> to vector<16x256xf32>
    %14 = arith.addf %11, %13 : vector<16x256xf32>
    %cst_11 = arith.constant 0.000000e+00 : f32
    %15 = vector.broadcast %cst_11 : f32 to vector<16x256xf32>
    %16 = arith.maximumf %14, %15 : vector<16x256xf32>
    %17 = arith.truncf %16 : vector<16x256xf32> to vector<16x256xbf16>
    %c0_12 = arith.constant 0 : index
    %c0_13 = arith.constant 0 : index
    %18 = vector.load %arg6[%c0_12, %c0_13] : memref<256x128xbf16, #tpu.memory_space<vmem>>, vector<256x128xbf16>
    %cst_14 = arith.constant dense<0.000000e+00> : vector<16x128xf32>
    %19 = tpu.matmul %17, %18, %cst_14 {dimension_numbers = #tpu.dot_dimension_numbers<[1], [0], [0], [1], [0, 0, 1, 1], [], []>} : vector<16x256xbf16>, vector<256x128xbf16>, vector<16x128xf32> -> vector<16x128xf32>
    %c0_15 = arith.constant 0 : index
    %c0_16 = arith.constant 0 : index
    %20 = vector.load %arg7[%c0_15, %c0_16] : memref<1x128xf32, #tpu.memory_space<vmem>>, vector<1x128xf32>
    %21 = vector.broadcast %20 : vector<1x128xf32> to vector<16x128xf32>
    %22 = arith.addf %19, %21 : vector<16x128xf32>
    %c0_17 = arith.constant 0 : index
    %c0_18 = arith.constant 0 : index
    %23 = vector.load %arg8[%c0_17, %c0_18] : memref<16x128xf32, #tpu.memory_space<vmem>>, vector<16x128xf32>
    tpu.vector_store %arg8[%c0_17, %c0_18], %22 {strides = array<i32>} : memref<16x128xf32, #tpu.memory_space<vmem>>, vector<16x128xf32>,
    return
  }
  func.func @transform_0(%arg0: i32) -> (i32, i32) {
    %c0_i32 = arith.constant 0 : i32
    %c0_i32_0 = arith.constant 0 : i32
    return %arg0, %c0_i32 : i32, i32
  }
  func.func @transform_1(%arg0: i32) -> (i32, i32) {
    %c0_i32 = arith.constant 0 : i32
    %c0_i32_0 = arith.constant 0 : i32
    %c0_i32_1 = arith.constant 0 : i32
    return %c0_i32, %c0_i32_0 : i32, i32
  }
  func.func @transform_2(%arg0: i32) -> (i32, i32) {
    %c0_i32 = arith.constant 0 : i32
    %c0_i32_0 = arith.constant 0 : i32
    %c0_i32_1 = arith.constant 0 : i32
    return %c0_i32, %c0_i32_0 : i32, i32
  }
  func.func @transform_3(%arg0: i32) -> (i32, i32) {
    %c0_i32 = arith.constant 0 : i32
    %c0_i32_0 = arith.constant 0 : i32
    %c0_i32_1 = arith.constant 0 : i32
    return %c0_i32, %c0_i32_0 : i32, i32
  }
  func.func @transform_4(%arg0: i32) -> (i32, i32) {
    %c0_i32 = arith.constant 0 : i32
    %c0_i32_0 = arith.constant 0 : i32
    %c0_i32_1 = arith.constant 0 : i32
    return %c0_i32, %c0_i32_0 : i32, i32
  }
  func.func @transform_5(%arg0: i32) -> (i32, i32) {
    %c0_i32 = arith.constant 0 : i32
    %c0_i32_0 = arith.constant 0 : i32
    %c0_i32_1 = arith.constant 0 : i32
    return %c0_i32, %c0_i32_0 : i32, i32
  }
  func.func @transform_6(%arg0: i32) -> (i32, i32) {
    %c0_i32 = arith.constant 0 : i32
    %c0_i32_0 = arith.constant 0 : i32
    %c0_i32_1 = arith.constant 0 : i32
    return %c0_i32, %c0_i32_0 : i32, i32
  }
  func.func @transform_7(%arg0: i32) -> (i32, i32) {
    %c0_i32 = arith.constant 0 : i32
    %c0_i32_0 = arith.constant 0 : i32
    return %arg0, %c0_i32 : i32, i32
  }
}

</mosaic_0001>

<bundles_post_ra>
// kernel: tpu_custom_call.1
= control target key start
LH: loop header
LB: loop body
LE: loop exit
PB: predicated region body
PF: predicated region fallthrough
CT: control target
= control target key end

     0   :  { %12 = vsyncpa [#allocation3], 0  ;;  %s2303_s0 = inlined_call_operand.hbm [shape: f32[16,256], index: 0, kind: input, shape index: {}]   ;;  %s2304_s1 = inlined_call_operand.hbm [shape: bf16[256,512], index: 1, kind: input, shape index: {}]   ;;  %s2305_s2 = inlined_call_operand.hbm [shape: f32[1,512], index: 2, kind: input, shape index: {}]   ;;  %s2306_s3 = inlined_call_operand.hbm [shape: bf16[512,256], index: 3, kind: input, shape index: {}]   ;;  %s2307_s4 = inlined_call_operand.vmem [shape: f32[1,256], index: 4, kind: input, shape index: {}]   ;;  %s2308_s5 = inlined_call_operand.hbm [shape: bf16[256,128], index: 5, kind: input, shape index: {}]   ;;  %s2309_s6 = inlined_call_operand.vmem [shape: f32[1,128], index: 6, kind: input, shape index: {}]   ;;  %s2310_s7 = inlined_call_operand.hbm [shape: f32[16,128], index: 7, kind: output, shape index: {}]  }
   0x1   :  { %13 = vsyncpa [#allocation6], 0 }
   0x2   :  { %14 = vsyncpa [#allocation9], 0 }
   0x3   :  { %15 = vsyncpa [#allocation4], 0  ;;  %s33_s26 = sshll.u32 %s2304_s1, 4  ;;  %s2203_s27 = smov [#allocation5]   ;;  %s34_s26 = int_to_ptr.hbm [resolvable:$true] %s33_s26 }
   0x4   :  { %s35_s28 = sshll.u32 %s2203_s27, 4  ;;  %s57_s8 = sshll.u32 %s2306_s3, 4  ;;  %s36_s28 = int_to_ptr.vmem [resolvable:$true] %s35_s28  ;;  %s58_s8 = int_to_ptr.hbm [resolvable:$true] %s57_s8 }
   0x5   :  { %s2204_s9 = smov 256   ;;  %s2205_s10 = smov 16  }
   0x6   :  { %41 = dma.hbm_to_vmem [thread:$0]  %s34_s26, 8192, %s36_s28, [#allocation6], %s2204_s9, %s2204_s9, %s2205_s10  }
   0x7   :  { %s2206_s11 = smov [#allocation8]   ;;  %s2207_s13 = smov 128  }
   0x8   :  { %s59_s12 = sshll.u32 %s2206_s11, 4  ;;  %s2208_s14 = smov 8   ;;  %s60_s12 = int_to_ptr.vmem [resolvable:$true] %s59_s12 }
   0x9   :  { %65 = dma.hbm_to_vmem [thread:$0]  %s58_s8, 8192, %s60_s12, [#allocation9], %s2207_s13, %s2207_s13, %s2208_s14  }
   0xa   :  { %s20_s16 = sshll.u32 %s2303_s0, 4  ;;  %s2209_s17 = smov [#allocation2]   ;;  %s21_s16 = int_to_ptr.hbm [resolvable:$true] %s20_s16 }
   0xb   :  { %s22_s3 = sshll.u32 %s2209_s17, 4  ;;  %s47_s20 = sshll.u32 %s2305_s2, 4  ;;  %s23_s3 = int_to_ptr.vmem [resolvable:$true] %s22_s3  ;;  %s48_s20 = int_to_ptr.hbm [resolvable:$true] %s47_s20 }
   0xc   :  { %28 = dma.hbm_to_vmem [thread:$0]  %s21_s16, 512, %s23_s3, [#allocation3], %s2204_s9, %s2204_s9, %s2205_s10  }
   0xd   :  { %s2210_s21 = smov [#allocation7]   ;;  %s72_s25 = sshll.u32 %s2308_s5, 4  ;;  %s73_s25 = int_to_ptr.hbm [resolvable:$true] %s72_s25 }
   0xe   :  { %s49_s22 = sshll.u32 %s2210_s21, 4  ;;  %s2211_s0 = smov [#allocation10]   ;;  %s50_s22 = int_to_ptr.vmem [resolvable:$true] %s49_s22 }
   0xf   :  { %52 = dma.hbm_to_vmem [thread:$0]  %s48_s20, 64, %s50_s22, [#allocation6]  }
  0x10   :  { %s74_s26 = sshll.u32 %s2211_s0, 4  ;;  %s2212_s27 = smov 64   ;;  %s75_s26 = int_to_ptr.vmem [resolvable:$true] %s74_s26 }
  0x11   :  { %s2213_s28 = smov 4  }
  0x12   :  { %80 = dma.hbm_to_vmem [thread:$0]  %s73_s25, 2048, %s75_s26, [#allocation9], %s2212_s27, %s2212_s27, %s2213_s28  }
  0x13   :  { %2195 = dma.done.wait [#allocation3], 512  }
  0x14   :  { %2196 = vsyncadd [#allocation3], 4294966784 }
  0x15   :  { %2197 = dma.done.wait [#allocation6], 8256  }
  0x16   :  { %2198 = vsyncadd [#allocation6], 4294959040 }
  0x17   :  { %2199 = dma.done.wait [#allocation9], 10240  }
  0x18   :  { %2200 = vsyncadd [#allocation9], 4294957056  ;;  %v1432_v0 = vld [vmem:[#allocation5 + $0xe0] sm:$0xf]  ;;  %v1924_v1 = vld [vmem:[#allocation5 + $0xec] sm:$0xf0] }
  0x19   :  { %v1560_v2 = vld [vmem:[#allocation5 + $0x1e0] sm:$0xf]  ;;  %v1433_v3 = vor.u32 %v1924_v1, %v1432_v0  ;;  %v1956_v4 = vld [vmem:[#allocation5 + $0x1ec] sm:$0xf0]  ;;  %v1922_v5 = vld [vmem:[#allocation5 + $0xe4] sm:$0xf] }
  0x1a   :  { %v1434_v6 = vld [vmem:[#allocation5 + $0xf0] sm:$0xf0]  ;;  %v1561_v7 = vor.u32 %v1956_v4, %v1560_v2  ;;  %v1954_v9 = vld [vmem:[#allocation5 + $0x1e4] sm:$0xf]  ;;  %v1416_v11 = vld [vmem:[#allocation5 + $0xc0] sm:$0xf] }
  0x1b   :  { %v1437_v8 = vor.u32 %v1922_v5, %v1434_v6  ;;  %v1562_v10 = vld [vmem:[#allocation5 + $0x1f0] sm:$0xf0]  ;;  %503 = vmatpush.bf16.msra.mxu0 %v1433_v3  ;;  %v1920_v13 = vld [vmem:[#allocation5 + $0xcc] sm:$0xf0]  ;;  %v1544_v14 = vld [vmem:[#allocation5 + $0x1c0] sm:$0xf] }
  0x1c   :  { %v1565_v12 = vor.u32 %v1954_v9, %v1562_v10  ;;  %v1952_v15 = vld [vmem:[#allocation5 + $0x1cc] sm:$0xf0]  ;;  %517 = vmatpush.bf16.msra.mxu1 %v1561_v7  ;;  %v1417_v16 = vor.u32 %v1920_v13, %v1416_v11  ;;  %v1918_v18 = vld [vmem:[#allocation5 + $0xc4] sm:$0xf]  ;;  %v1418_v19 = vld [vmem:[#allocation5 + $0xd0] sm:$0xf0] }
  0x1d   :  { %531 = vmatpush.bf16.msra.mxu2 %v1437_v8  ;;  %v1545_v17 = vor.u32 %v1952_v15, %v1544_v14  ;;  %v1950_v20 = vld [vmem:[#allocation5 + $0x1c4] sm:$0xf]  ;;  %v1421_v21 = vor.u32 %v1918_v18, %v1418_v19  ;;  %v1546_v22 = vld [vmem:[#allocation5 + $0x1d0] sm:$0xf0]  ;;  %v1400_v23 = vld [vmem:[#allocation5 + $0xa0] sm:$0xf] }
  0x1e   :  { %545 = vmatpush.bf16.msra.mxu3 %v1565_v12  ;;  %v1916_v24 = vld [vmem:[#allocation5 + $0xac] sm:$0xf0]  ;;  %v1549_v25 = vor.u32 %v1950_v20, %v1546_v22  ;;  %v1528_v26 = vld [vmem:[#allocation5 + $0x1a0] sm:$0xf]  ;;  %v1914_v28 = vld [vmem:[#allocation5 + $0xa4] sm:$0xf] }
  0x1f   :  { %v1948_v27 = vld [vmem:[#allocation5 + $0x1ac] sm:$0xf0]  ;;  %504 = vmatpush.bf16.msra.mxu0 %v1417_v16  ;;  %v1401_v29 = vor.u32 %v1916_v24, %v1400_v23  ;;  %v1402_v30 = vld [vmem:[#allocation5 + $0xb0] sm:$0xf0]  ;;  %v1946_v31 = vld [vmem:[#allocation5 + $0x1a4] sm:$0xf] }
  0x20   :  { %v1530_v32 = vld [vmem:[#allocation5 + $0x1b0] sm:$0xf0]  ;;  %518 = vmatpush.bf16.msra.mxu1 %v1545_v17  ;;  %v1529_v33 = vor.u32 %v1948_v27, %v1528_v26  ;;  %v1405_v34 = vor.u32 %v1914_v28, %v1402_v30  ;;  %v1384_v35 = vld [vmem:[#allocation5 + $0x80] sm:$0xf]  ;;  %v1912_v36 = vld [vmem:[#allocation5 + $0x8c] sm:$0xf0] }
  0x21   :  { %532 = vmatpush.bf16.msra.mxu2 %v1421_v21  ;;  %v1512_v37 = vld [vmem:[#allocation5 + $0x180] sm:$0xf]  ;;  %v1533_v38 = vor.u32 %v1946_v31, %v1530_v32  ;;  %v1944_v39 = vld [vmem:[#allocation5 + $0x18c] sm:$0xf0]  ;;  %v1910_v40 = vld [vmem:[#allocation5 + $0x84] sm:$0xf]  ;;  %v1385_v44 = vor.u32 %v1912_v36, %v1384_v35 }
  0x22   :  { %546 = vmatpush.bf16.msra.mxu3 %v1549_v25  ;;  %v1386_v41 = vld [vmem:[#allocation5 + $0x90] sm:$0xf0]  ;;  %v1942_v42 = vld [vmem:[#allocation5 + $0x184] sm:$0xf]  ;;  %v1513_v45 = vor.u32 %v1944_v39, %v1512_v37  ;;  %v1368_v47 = vld [vmem:[#allocation5 + $0x60] sm:$0xf] }
  0x23   :  { %v1514_v43 = vld [vmem:[#allocation5 + $0x190] sm:$0xf0]  ;;  %505 = vmatpush.bf16.msra.mxu0 %v1401_v29  ;;  %v1389_v46 = vor.u32 %v1910_v40, %v1386_v41  ;;  %v1908_v48 = vld [vmem:[#allocation5 + $0x6c] sm:$0xf0]  ;;  %v1496_v49 = vld [vmem:[#allocation5 + $0x160] sm:$0xf] }
  0x24   :  { %519 = vmatpush.bf16.msra.mxu1 %v1529_v33  ;;  %v1517_v50 = vor.u32 %v1942_v42, %v1514_v43  ;;  %v1940_v51 = vld [vmem:[#allocation5 + $0x16c] sm:$0xf0]  ;;  %v1906_v52 = vld [vmem:[#allocation5 + $0x64] sm:$0xf]  ;;  %v1370_v53 = vld [vmem:[#allocation5 + $0x70] sm:$0xf0]  ;;  %v1369_v56 = vor.u32 %v1908_v48, %v1368_v47 }
  0x25   :  { %533 = vmatpush.bf16.msra.mxu2 %v1405_v34  ;;  %v1938_v54 = vld [vmem:[#allocation5 + $0x164] sm:$0xf]  ;;  %v1498_v55 = vld [vmem:[#allocation5 + $0x170] sm:$0xf0]  ;;  %v1497_v57 = vor.u32 %v1940_v51, %v1496_v49  ;;  %v1373_v58 = vor.u32 %v1906_v52, %v1370_v53  ;;  %v1352_v59 = vld [vmem:[#allocation5 + $0x40] sm:$0xf] }
  0x26   :  { %547 = vmatpush.bf16.msra.mxu3 %v1533_v38  ;;  %v1904_v60 = vld [vmem:[#allocation5 + $0x4c] sm:$0xf0]  ;;  %v1480_v61 = vld [vmem:[#allocation5 + $0x140] sm:$0xf]  ;;  %v1501_v62 = vor.u32 %v1938_v54, %v1498_v55  ;;  %v1902_v0 = vld [vmem:[#allocation5 + $0x44] sm:$0xf] }
  0x27   :  { %506 = vmatpush.bf16.msra.mxu0 %v1385_v44  ;;  %v1936_v63 = vld [vmem:[#allocation5 + $0x14c] sm:$0xf0]  ;;  %v1354_v1 = vld [vmem:[#allocation5 + $0x50] sm:$0xf0]  ;;  %v1934_v2 = vld [vmem:[#allocation5 + $0x144] sm:$0xf]  ;;  %v1353_v4 = vor.u32 %v1904_v60, %v1352_v59 }
  0x28   :  { %520 = vmatpush.bf16.msra.mxu1 %v1513_v45  ;;  %v1482_v3 = vld [vmem:[#allocation5 + $0x150] sm:$0xf0]  ;;  %v1481_v5 = vor.u32 %v1936_v63, %v1480_v61  ;;  %v1357_v6 = vor.u32 %v1902_v0, %v1354_v1  ;;  %v1336_v7 = vld [vmem:[#allocation5 + $0x20] sm:$0xf]  ;;  %v1900_v8 = vld [vmem:[#allocation5 + $0x2c] sm:$0xf0] }
  0x29   :  { %534 = vmatpush.bf16.msra.mxu2 %v1389_v46  ;;  %v1464_v9 = vld [vmem:[#allocation5 + $0x120] sm:$0xf]  ;;  %v1485_v10 = vor.u32 %v1934_v2, %v1482_v3  ;;  %v1932_v11 = vld [vmem:[#allocation5 + $0x12c] sm:$0xf0]  ;;  %v1898_v12 = vld [vmem:[#allocation5 + $0x24] sm:$0xf]  ;;  %v1337_v16 = vor.u32 %v1900_v8, %v1336_v7 }
  0x2a   :  { %548 = vmatpush.bf16.msra.mxu3 %v1517_v50  ;;  %v1338_v13 = vld [vmem:[#allocation5 + $0x30] sm:$0xf0]  ;;  %v1930_v14 = vld [vmem:[#allocation5 + $0x124] sm:$0xf]  ;;  %v1320_v17 = vld [vmem:[#allocation5] sm:$0xf]  ;;  %v1465_v20 = vor.u32 %v1932_v11, %v1464_v9 }
  0x2b   :  { %507 = vmatpush.bf16.msra.mxu0 %v1369_v56  ;;  %v1466_v15 = vld [vmem:[#allocation5 + $0x130] sm:$0xf0]  ;;  %v1896_v18 = vld [vmem:[#allocation5 + $0xc] sm:$0xf0]  ;;  %v1448_v19 = vld [vmem:[#allocation5 + $0x100] sm:$0xf]  ;;  %v1341_v21 = vor.u32 %v1898_v12, %v1338_v13 }
  0x2c   :  { %521 = vmatpush.bf16.msra.mxu1 %v1497_v57  ;;  %v1928_v22 = vld [vmem:[#allocation5 + $0x10c] sm:$0xf0]  ;;  %v1894_v23 = vld [vmem:[#allocation5 + $0x4] sm:$0xf]  ;;  %v1322_v24 = vld [vmem:[#allocation5 + $0x10] sm:$0xf0]  ;;  %v1469_v25 = vor.u32 %v1930_v14, %v1466_v15  ;;  %v1321_v32 = vor.u32 %v1896_v18, %v1320_v17 }
  0x2d   :  { %535 = vmatpush.bf16.msra.mxu2 %v1373_v58  ;;  %v1926_v26 = vld [vmem:[#allocation5 + $0x104] sm:$0xf]  ;;  %v1450_v27 = vld [vmem:[#allocation5 + $0x110] sm:$0xf0]  ;;  %v1440_v28 = vld [vmem:[#allocation5 + $0xe8] sm:$0xf]  ;;  %v1449_v36 = vor.u32 %v1928_v22, %v1448_v19  ;;  %v1325_v37 = vor.u32 %v1894_v23, %v1322_v24 }
  0x2e   :  { %549 = vmatpush.bf16.msra.mxu3 %v1501_v62  ;;  %v1925_v29 = vld [vmem:[#allocation5 + $0xf4] sm:$0xf0]  ;;  %v1568_v30 = vld [vmem:[#allocation5 + $0x1e8] sm:$0xf]  ;;  %v1923_v33 = vld [vmem:[#allocation5 + $0xec] sm:$0xf]  ;;  %v1453_v41 = vor.u32 %v1926_v26, %v1450_v27 }
  0x2f   :  { %508 = vmatpush.bf16.msra.mxu0 %v1353_v4  ;;  %v1957_v31 = vld [vmem:[#allocation5 + $0x1f4] sm:$0xf0]  ;;  %v1442_v34 = vld [vmem:[#allocation5 + $0xf8] sm:$0xf0]  ;;  %v1955_v35 = vld [vmem:[#allocation5 + $0x1ec] sm:$0xf]  ;;  %v1441_v42 = vor.u32 %v1925_v29, %v1440_v28 }
  0x30   :  { %522 = vmatpush.bf16.msra.mxu1 %v1481_v5  ;;  %v1570_v38 = vld [vmem:[#allocation5 + $0x1f8] sm:$0xf0]  ;;  %v103_v39 = vld [vmem:[#allocation2] sm:$0xff]  ;;  %v105_v40 = vld [vmem:[#allocation2 + $0x10] sm:$0xff]  ;;  %v1569_v45 = vor.u32 %v1957_v31, %v1568_v30  ;;  %v1445_v46 = vor.u32 %v1923_v33, %v1442_v34  ;;  %s2214_s30 = smov [#allocation11]   ;;  %s1303_s11 = sshll.u32 %s2310_s7, 4  ;;  %s1304_s11 = int_to_ptr.hbm [resolvable:$true] %s1303_s11 }
  0x31   :  { %536 = vmatpush.bf16.msra.mxu2 %v1357_v6  ;;  %v104_v43 = vld [vmem:[#allocation2 + $0x8] sm:$0xff]  ;;  %v106_v44 = vld [vmem:[#allocation2 + $0x18] sm:$0xff]  ;;  %v1573_v50 = vor.u32 %v1955_v35, %v1570_v38  ;;  %v2273_v51 = vpack.c.bf16 %v105_v40, %v103_v39  ;;  %s1301_s8 = sshll.u32 %s2214_s30, 4  ;;  %s1302_s8 = int_to_ptr.vmem [resolvable:$true] %s1301_s8 }
  0x32   :  { %550 = vmatpush.bf16.msra.mxu3 %v1485_v10  ;;  %v1424_v47 = vld [vmem:[#allocation5 + $0xc8] sm:$0xf]  ;;  %v1921_v48 = vld [vmem:[#allocation5 + $0xd4] sm:$0xf0]  ;;  %v1919_v53 = vld [vmem:[#allocation5 + $0xcc] sm:$0xf]  ;;  %v2275_v55 = vpack.c.bf16 %v106_v44, %v104_v43 }
  0x33   :  { %509 = vmatpush.bf16.msra.mxu0 %v1337_v16  ;;  %v1552_v49 = vld [vmem:[#allocation5 + $0x1c8] sm:$0xf]  ;;  %v1953_v52 = vld [vmem:[#allocation5 + $0x1d4] sm:$0xf0]  ;;  %v1426_v54 = vld [vmem:[#allocation5 + $0xd8] sm:$0xf0]  ;;  %v1425_v58 = vor.u32 %v1921_v48, %v1424_v47 }
  0x34   :  { %523 = vmatpush.bf16.msra.mxu1 %v1465_v20  ;;  %v1951_v56 = vld [vmem:[#allocation5 + $0x1cc] sm:$0xf]  ;;  %v1554_v57 = vld [vmem:[#allocation5 + $0x1d8] sm:$0xf0]  ;;  %v1553_v59 = vor.u32 %v1953_v52, %v1552_v49  ;;  %v1429_v60 = vor.u32 %v1919_v53, %v1426_v54  ;;  %v1408_v61 = vld [vmem:[#allocation5 + $0xa8] sm:$0xf] }
  0x35   :  { %537 = vmatpush.bf16.msra.mxu2 %v1341_v21  ;;  %v1917_v62 = vld [vmem:[#allocation5 + $0xb4] sm:$0xf0]  ;;  %v1536_v63 = vld [vmem:[#allocation5 + $0x1a8] sm:$0xf]  ;;  %v1557_v0 = vor.u32 %v1951_v56, %v1554_v57  ;;  %v1915_v2 = vld [vmem:[#allocation5 + $0xac] sm:$0xf] }
  0x36   :  { %551 = vmatpush.bf16.msra.mxu3 %v1469_v25  ;;  %v1949_v1 = vld [vmem:[#allocation5 + $0x1b4] sm:$0xf0]  ;;  %v1410_v3 = vld [vmem:[#allocation5 + $0xb8] sm:$0xf0]  ;;  %v1947_v4 = vld [vmem:[#allocation5 + $0x1ac] sm:$0xf]  ;;  %v1409_v6 = vor.u32 %v1917_v62, %v1408_v61 }
  0x37   :  { %510 = vmatpush.bf16.msra.mxu0 %v1321_v32  ;;  %v1538_v5 = vld [vmem:[#allocation5 + $0x1b8] sm:$0xf0]  ;;  %v1537_v7 = vor.u32 %v1949_v1, %v1536_v63  ;;  %v1413_v8 = vor.u32 %v1915_v2, %v1410_v3  ;;  %v1392_v9 = vld [vmem:[#allocation5 + $0x88] sm:$0xf]  ;;  %v1913_v10 = vld [vmem:[#allocation5 + $0x94] sm:$0xf0] }
  0x38   :  { %524 = vmatpush.bf16.msra.mxu1 %v1449_v36  ;;  %v1520_v11 = vld [vmem:[#allocation5 + $0x188] sm:$0xf]  ;;  %v1541_v12 = vor.u32 %v1947_v4, %v1538_v5  ;;  %v1945_v13 = vld [vmem:[#allocation5 + $0x194] sm:$0xf0]  ;;  %v1911_v14 = vld [vmem:[#allocation5 + $0x8c] sm:$0xf]  ;;  %v1393_v18 = vor.u32 %v1913_v10, %v1392_v9 }
  0x39   :  { %538 = vmatpush.bf16.msra.mxu2 %v1325_v37  ;;  %v1394_v15 = vld [vmem:[#allocation5 + $0x98] sm:$0xf0]  ;;  %v1943_v16 = vld [vmem:[#allocation5 + $0x18c] sm:$0xf]  ;;  %v1521_v19 = vor.u32 %v1945_v13, %v1520_v11  ;;  %v1376_v21 = vld [vmem:[#allocation5 + $0x68] sm:$0xf] }
  0x3a   :  { %552 = vmatpush.bf16.msra.mxu3 %v1453_v41  ;;  %511 = vmatmul.bf16.vlgmr.msra.gmra.mxu0 %v2273_v51  ;;  %v1522_v17 = vld [vmem:[#allocation5 + $0x198] sm:$0xf0]  ;;  %v1397_v20 = vor.u32 %v1911_v14, %v1394_v15  ;;  %v1909_v22 = vld [vmem:[#allocation5 + $0x74] sm:$0xf0]  ;;  %v1504_v23 = vld [vmem:[#allocation5 + $0x168] sm:$0xf] }
  0x3b   :  { %559 = vmatpush.bf16.msrb.mxu0 %v1441_v42  ;;  %525 = vmatmul.bf16.vlgmr.msra.gmra.mxu1 %v2275_v55  ;;  %v1525_v24 = vor.u32 %v1943_v16, %v1522_v17  ;;  %v1941_v25 = vld [vmem:[#allocation5 + $0x174] sm:$0xf0]  ;;  %v1907_v26 = vld [vmem:[#allocation5 + $0x6c] sm:$0xf]  ;;  %v1378_v27 = vld [vmem:[#allocation5 + $0x78] sm:$0xf0]  ;;  %v1377_v30 = vor.u32 %v1909_v22, %v1376_v21 }
  0x3c   :  { %573 = vmatpush.bf16.msrb.mxu1 %v1569_v45  ;;  %539 = vmatmul.bf16.vlgmr.msra.gmra.mxu2 %v2273_v51  ;;  %v1939_v28 = vld [vmem:[#allocation5 + $0x16c] sm:$0xf]  ;;  %v1506_v29 = vld [vmem:[#allocation5 + $0x178] sm:$0xf0]  ;;  %v1505_v31 = vor.u32 %v1941_v25, %v1504_v23  ;;  %v1381_v32 = vor.u32 %v1907_v26, %v1378_v27  ;;  %v1360_v33 = vld [vmem:[#allocation5 + $0x48] sm:$0xf] }
  0x3d   :  { %587 = vmatpush.bf16.msrb.mxu2 %v1445_v46  ;;  %553 = vmatmul.bf16.vlgmr.msra.gmra.mxu3 %v2275_v55  ;;  %v1905_v34 = vld [vmem:[#allocation5 + $0x54] sm:$0xf0]  ;;  %v1488_v35 = vld [vmem:[#allocation5 + $0x148] sm:$0xf]  ;;  %v1509_v36 = vor.u32 %v1939_v28, %v1506_v29  ;;  %v1903_v38 = vld [vmem:[#allocation5 + $0x4c] sm:$0xf] }
  0x3e   :  { %601 = vmatpush.bf16.msrb.mxu3 %v1573_v50  ;;  %v1937_v37 = vld [vmem:[#allocation5 + $0x154] sm:$0xf0]  ;;  %v1362_v39 = vld [vmem:[#allocation5 + $0x58] sm:$0xf0]  ;;  %v1935_v40 = vld [vmem:[#allocation5 + $0x14c] sm:$0xf]  ;;  %v1361_v42 = vor.u32 %v1905_v34, %v1360_v33 }
  0x3f   :  { %560 = vmatpush.bf16.msrb.mxu0 %v1425_v58  ;;  %v1490_v41 = vld [vmem:[#allocation5 + $0x158] sm:$0xf0]  ;;  %v1344_v43 = vld [vmem:[#allocation5 + $0x28] sm:$0xf]  ;;  %v1489_v44 = vor.u32 %v1937_v37, %v1488_v35  ;;  %v1365_v45 = vor.u32 %v1903_v38, %v1362_v39  ;;  %v1901_v46 = vld [vmem:[#allocation5 + $0x34] sm:$0xf0] }
  0x40   :  { %574 = vmatpush.bf16.msrb.mxu1 %v1553_v59  ;;  %v1472_v47 = vld [vmem:[#allocation5 + $0x128] sm:$0xf]  ;;  %v1493_v48 = vor.u32 %v1935_v40, %v1490_v41  ;;  %v1933_v49 = vld [vmem:[#allocation5 + $0x134] sm:$0xf0]  ;;  %v1899_v50 = vld [vmem:[#allocation5 + $0x2c] sm:$0xf]  ;;  %v1345_v56 = vor.u32 %v1901_v46, %v1344_v43 }
  0x41   :  { %588 = vmatpush.bf16.msrb.mxu2 %v1429_v60  ;;  %v1346_v52 = vld [vmem:[#allocation5 + $0x38] sm:$0xf0]  ;;  %v1931_v53 = vld [vmem:[#allocation5 + $0x12c] sm:$0xf]  ;;  %v1328_v57 = vld [vmem:[#allocation5 + $0x8] sm:$0xf]  ;;  %v1473_v58 = vor.u32 %v1933_v49, %v1472_v47 }
  0x42   :  { %602 = vmatpush.bf16.msrb.mxu3 %v1557_v0  ;;  %v1474_v54 = vld [vmem:[#allocation5 + $0x138] sm:$0xf0]  ;;  %v1349_v59 = vor.u32 %v1899_v50, %v1346_v52  ;;  %v1897_v60 = vld [vmem:[#allocation5 + $0x14] sm:$0xf0]  ;;  %v1456_v61 = vld [vmem:[#allocation5 + $0x108] sm:$0xf] }
  0x43   :  { %561 = vmatpush.bf16.msrb.mxu0 %v1409_v6  ;;  %v1929_v62 = vld [vmem:[#allocation5 + $0x114] sm:$0xf0]  ;;  %v1477_v63 = vor.u32 %v1931_v53, %v1474_v54  ;;  %v1895_v0 = vld [vmem:[#allocation5 + $0xc] sm:$0xf]  ;;  %v1330_v1 = vld [vmem:[#allocation5 + $0x18] sm:$0xf0]  ;;  %v1329_v6 = vor.u32 %v1897_v60, %v1328_v57 }
  0x44   :  { %575 = vmatpush.bf16.msrb.mxu1 %v1537_v7  ;;  %v1927_v2 = vld [vmem:[#allocation5 + $0x10c] sm:$0xf]  ;;  %v1458_v3 = vld [vmem:[#allocation5 + $0x118] sm:$0xf0]  ;;  %v1632_v4 = vld [vmem:[#allocation8 + $0x70] sm:$0xf]  ;;  %v1457_v9 = vor.u32 %v1929_v62, %v1456_v61  ;;  %v1333_v10 = vor.u32 %v1895_v0, %v1330_v1 }
  0x45   :  { %589 = vmatpush.bf16.msrb.mxu2 %v1413_v8  ;;  %v1973_v5 = vld [vmem:[#allocation8 + $0x74] sm:$0xf0]  ;;  %v1696_v7 = vld [vmem:[#allocation8 + $0xf0] sm:$0xf]  ;;  %v1461_v11 = vor.u32 %v1927_v2, %v1458_v3  ;;  %v1624_v13 = vld [vmem:[#allocation8 + $0x60] sm:$0xf] }
  0x46   :  { %603 = vmatpush.bf16.msrb.mxu3 %v1541_v12  ;;  %v1989_v8 = vld [vmem:[#allocation8 + $0xf4] sm:$0xf0]  ;;  %v1633_v12 = vor.u32 %v1973_v5, %v1632_v4  ;;  %v1971_v14 = vld [vmem:[#allocation8 + $0x64] sm:$0xf0]  ;;  %v1688_v16 = vld [vmem:[#allocation8 + $0xe0] sm:$0xf] }
  0x47   :  { %562 = vmatpush.bf16.msrb.mxu0 %v1393_v18  ;;  %v1697_v15 = vor.u32 %v1989_v8, %v1696_v7  ;;  %v1987_v17 = vld [vmem:[#allocation8 + $0xe4] sm:$0xf0]  ;;  %v1625_v18 = vor.u32 %v1971_v14, %v1624_v13  ;;  %v1680_v22 = vld [vmem:[#allocation8 + $0xd0] sm:$0xf]  ;;  %v1985_v23 = vld [vmem:[#allocation8 + $0xd4] sm:$0xf0] }
  0x48   :  { %576 = vmatpush.bf16.msrb.mxu1 %v1521_v19  ;;  %v1616_v19 = vld [vmem:[#allocation8 + $0x50] sm:$0xf]  ;;  %v1689_v21 = vor.u32 %v1987_v17, %v1688_v16  ;;  %v1608_v25 = vld [vmem:[#allocation8 + $0x40] sm:$0xf]  ;;  %v1967_v26 = vld [vmem:[#allocation8 + $0x44] sm:$0xf0]  ;;  %v1681_v27 = vor.u32 %v1985_v23, %v1680_v22 }
  0x49   :  { %590 = vmatpush.bf16.msrb.mxu2 %v1397_v20  ;;  %v1969_v20 = vld [vmem:[#allocation8 + $0x54] sm:$0xf0]  ;;  %v1672_v28 = vld [vmem:[#allocation8 + $0xc0] sm:$0xf]  ;;  %v1983_v29 = vld [vmem:[#allocation8 + $0xc4] sm:$0xf0] }
  0x4a   :  { %604 = vmatpush.bf16.msrb.mxu3 %v1525_v24  ;;  %v1617_v24 = vor.u32 %v1969_v20, %v1616_v19  ;;  %v1673_v33 = vor.u32 %v1983_v29, %v1672_v28  ;;  %v1664_v34 = vld [vmem:[#allocation8 + $0xb0] sm:$0xf]  ;;  %v1656_v38 = vld [vmem:[#allocation8 + $0xa0] sm:$0xf]  ;;  %v1979_v39 = vld [vmem:[#allocation8 + $0xa4] sm:$0xf0] }
  0x4b   :  { %563 = vmatpush.bf16.msrb.mxu0 %v1377_v30  ;;  %v1609_v30 = vor.u32 %v1967_v26, %v1608_v25  ;;  %v1584_v41 = vld [vmem:[#allocation8 + $0x10] sm:$0xf]  ;;  %v1657_v43 = vor.u32 %v1979_v39, %v1656_v38  ;;  %v1959_v46 = vld [vmem:[#allocation8 + $0x4] sm:$0xf0]  ;;  %v2005_v49 = vld [vmem:[#allocation8 + $0x174] sm:$0xf0] }
  0x4c   :  { %577 = vmatpush.bf16.msrb.mxu1 %v1505_v31  ;;  %v1600_v31 = vld [vmem:[#allocation8 + $0x30] sm:$0xf]  ;;  %v1972_v50 = vld [vmem:[#allocation8 + $0x74] sm:$0xf]  ;;  %v1634_v53 = vld [vmem:[#allocation8 + $0x78] sm:$0xf0] }
  0x4d   :  { %591 = vmatpush.bf16.msrb.mxu2 %v1381_v32  ;;  %v1965_v32 = vld [vmem:[#allocation8 + $0x34] sm:$0xf0]  ;;  %v1648_v54 = vld [vmem:[#allocation8 + $0x90] sm:$0xf]  ;;  %v1637_v57 = vor.u32 %v1972_v50, %v1634_v53  ;;  %v2003_v60 = vld [vmem:[#allocation8 + $0x164] sm:$0xf0] }
  0x4e   :  { %605 = vmatpush.bf16.msrb.mxu3 %v1509_v36  ;;  %v1601_v35 = vor.u32 %v1965_v32, %v1600_v31  ;;  %v1963_v36 = vld [vmem:[#allocation8 + $0x24] sm:$0xf0]  ;;  %v1970_v62 = vld [vmem:[#allocation8 + $0x64] sm:$0xf]  ;;  %v1640_v0 = vld [vmem:[#allocation8 + $0x80] sm:$0xf] }
  0x4f   :  { %564 = vmatpush.bf16.msrb.mxu0 %v1361_v42  ;;  %v1961_v42 = vld [vmem:[#allocation8 + $0x14] sm:$0xf0]  ;;  %v1975_v2 = vld [vmem:[#allocation8 + $0x84] sm:$0xf0]  ;;  %v1824_v3 = vld [vmem:[#allocation8 + $0x1f0] sm:$0xf] }
  0x50   :  { %578 = vmatpush.bf16.msrb.mxu1 %v1489_v44  ;;  %v1585_v44 = vor.u32 %v1961_v42, %v1584_v41  ;;  %v2021_v4 = vld [vmem:[#allocation8 + $0x1f4] sm:$0xf0]  ;;  %v1641_v5 = vor.u32 %v1975_v2, %v1640_v0  ;;  %v1988_v7 = vld [vmem:[#allocation8 + $0xf4] sm:$0xf]  ;;  %v1698_v8 = vld [vmem:[#allocation8 + $0xf8] sm:$0xf0] }
  0x51   :  { %592 = vmatpush.bf16.msrb.mxu2 %v1365_v45  ;;  %v1576_v45 = vld [vmem:[#allocation8] sm:$0xf]  ;;  %v1618_v14 = vld [vmem:[#allocation8 + $0x58] sm:$0xf0]  ;;  %v2019_v17 = vld [vmem:[#allocation8 + $0x1e4] sm:$0xf0] }
  0x52   :  { %606 = vmatpush.bf16.msrb.mxu3 %v1493_v48  ;;  %v1577_v47 = vor.u32 %v1959_v46, %v1576_v45  ;;  %v1760_v48 = vld [vmem:[#allocation8 + $0x170] sm:$0xf]  ;;  %v1816_v16 = vld [vmem:[#allocation8 + $0x1e0] sm:$0xf]  ;;  %v1690_v20 = vld [vmem:[#allocation8 + $0xe8] sm:$0xf0] }
  0x53   :  { %565 = vmatpush.bf16.msrb.mxu0 %v1345_v56  ;;  %v1761_v52 = vor.u32 %v2005_v49, %v1760_v48  ;;  %v1977_v56 = vld [vmem:[#allocation8 + $0x94] sm:$0xf0]  ;;  %v1817_v19 = vor.u32 %v2019_v17, %v1816_v16  ;;  %v1736_v22 = vld [vmem:[#allocation8 + $0x140] sm:$0xf]  ;;  %v1999_v23 = vld [vmem:[#allocation8 + $0x144] sm:$0xf0] }
  0x54   :  { %579 = vmatpush.bf16.msrb.mxu1 %v1473_v58  ;;  %v1649_v58 = vor.u32 %v1977_v56, %v1648_v54  ;;  %v1737_v25 = vor.u32 %v1999_v23, %v1736_v22  ;;  %v1610_v26 = vld [vmem:[#allocation8 + $0x48] sm:$0xf0]  ;;  %v1808_v28 = vld [vmem:[#allocation8 + $0x1d0] sm:$0xf]  ;;  %v2017_v29 = vld [vmem:[#allocation8 + $0x1d4] sm:$0xf0] }
  0x55   :  { %593 = vmatpush.bf16.msrb.mxu2 %v1349_v59  ;;  %v1752_v59 = vld [vmem:[#allocation8 + $0x160] sm:$0xf]  ;;  %v1809_v31 = vor.u32 %v2017_v29, %v1808_v28  ;;  %v1682_v32 = vld [vmem:[#allocation8 + $0xd8] sm:$0xf0]  ;;  %v2015_v39 = vld [vmem:[#allocation8 + $0x1c4] sm:$0xf0] }
  0x56   :  { %607 = vmatpush.bf16.msrb.mxu3 %v1477_v63  ;;  %v1753_v61 = vor.u32 %v2003_v60, %v1752_v59  ;;  %v1626_v63 = vld [vmem:[#allocation8 + $0x68] sm:$0xf0]  ;;  %v1800_v38 = vld [vmem:[#allocation8 + $0x1c0] sm:$0xf]  ;;  %v1995_v45 = vld [vmem:[#allocation8 + $0x124] sm:$0xf0] }
  0x57   :  { %566 = vmatpush.bf16.msrb.mxu0 %v1329_v6  ;;  %v1629_v1 = vor.u32 %v1970_v62, %v1626_v63  ;;  %v1825_v6 = vor.u32 %v2021_v4, %v1824_v3  ;;  %v1801_v41 = vor.u32 %v2015_v39, %v1800_v38  ;;  %v1674_v42 = vld [vmem:[#allocation8 + $0xc8] sm:$0xf0]  ;;  %v1962_v46 = vld [vmem:[#allocation8 + $0x24] sm:$0xf]  ;;  %v2285_v49 = vld [vmem:[#allocation7] sm:$0xf] }
  0x58   :  { %580 = vmatpush.bf16.msrb.mxu1 %v1457_v9  ;;  %v1701_v9 = vor.u32 %v1988_v7, %v1698_v8  ;;  %v1594_v48 = vld [vmem:[#allocation8 + $0x28] sm:$0xf0]  ;;  %v2013_v53 = vld [vmem:[#allocation8 + $0x1b4] sm:$0xf0]  ;;  %v1980_v54 = vld [vmem:[#allocation8 + $0xb4] sm:$0xf] }
  0x59   :  { %594 = vmatpush.bf16.msrb.mxu2 %v1333_v10  ;;  %v1744_v10 = vld [vmem:[#allocation8 + $0x150] sm:$0xf]  ;;  %v1597_v50 = vor.u32 %v1962_v46, %v1594_v48  ;;  %v1993_v59 = vld [vmem:[#allocation8 + $0x114] sm:$0xf0]  ;;  %v1960_v62 = vld [vmem:[#allocation8 + $0x14] sm:$0xf] }
  0x5a   :  { %608 = vmatpush.bf16.msrb.mxu3 %v1461_v11  ;;  %567 = vmatmul.bf16.vlgmr.msrb.gmra.mxu0 %v2273_v51  ;;  %v2001_v11 = vld [vmem:[#allocation8 + $0x154] sm:$0xf0]  ;;  %v1586_v63 = vld [vmem:[#allocation8 + $0x18] sm:$0xf0]  ;;  %v1784_v0 = vld [vmem:[#allocation8 + $0x1a0] sm:$0xf] }
  0x5b   :  { %1017 = vmatpush.bf16.msra.mxu0 %v1633_v12  ;;  %581 = vmatmul.bf16.vlgmr.msrb.gmra.mxu1 %v2275_v55  ;;  %v1968_v12 = vld [vmem:[#allocation8 + $0x54] sm:$0xf]  ;;  %v1745_v13 = vor.u32 %v2001_v11, %v1744_v10  ;;  %v2011_v2 = vld [vmem:[#allocation8 + $0x1a4] sm:$0xf0]  ;;  %v1978_v3 = vld [vmem:[#allocation8 + $0xa4] sm:$0xf] }
  0x5c   :  { %1031 = vmatpush.bf16.msra.mxu1 %v1697_v15  ;;  %595 = vmatmul.bf16.vlgmr.msrb.gmra.mxu2 %v2273_v51  ;;  %v1981_v51 = vld [vmem:[#allocation8 + $0xb4] sm:$0xf0]  ;;  %v1621_v15 = vor.u32 %v1968_v12, %v1618_v14  ;;  %v1658_v4 = vld [vmem:[#allocation8 + $0xa8] sm:$0xf0]  ;;  %v175_v7 = vperm.slane %v2285_v49, 0 }
  0x5d   :  { %609 = vmatmul.bf16.vlgmr.msrb.gmra.mxu3 %v2275_v55  ;;  %v1592_v55 = vld [vmem:[#allocation8 + $0x20] sm:$0xf]  ;;  %v1665_v37 = vor.u32 %v1981_v51, %v1664_v34  ;;  %1045 = vmatpush.bf16.msra.mxu2 %v1761_v52  ;;  %v1728_v34 = vld [vmem:[#allocation8 + $0x130] sm:$0xf]  ;;  %v1997_v51 = vld [vmem:[#allocation8 + $0x134] sm:$0xf0] }
  0x5e   :  { %v1593_v40 = vor.u32 %v1963_v36, %v1592_v55  ;;  %1059 = vmatpush.bf16.msra.mxu3 %v1825_v6  ;;  %v1729_v55 = vor.u32 %v1997_v51, %v1728_v34  ;;  %v1602_v36 = vld [vmem:[#allocation8 + $0x38] sm:$0xf0]  ;;  %v1792_v52 = vld [vmem:[#allocation8 + $0x1b0] sm:$0xf]  ;;  %v1661_v6 = vor.u32 %v1978_v3, %v1658_v4  ;;  %v1704_v8 = vld [vmem:[#allocation8 + $0x100] sm:$0xf] }
  0x5f   :  { %1018 = vmatpush.bf16.msra.mxu0 %v1625_v18  ;;  %v1986_v18 = vld [vmem:[#allocation8 + $0xe4] sm:$0xf]  ;;  %v1793_v56 = vor.u32 %v2013_v53, %v1792_v52  ;;  %v1578_v12 = vld [vmem:[#allocation8 + $0x8] sm:$0xf0]  ;;  %v1762_v14 = vld [vmem:[#allocation8 + $0x178] sm:$0xf0] }
  0x60   :  { %1032 = vmatpush.bf16.msra.mxu1 %v1689_v21  ;;  %v1693_v21 = vor.u32 %v1986_v18, %v1690_v20  ;;  %v1958_v10 = vld [vmem:[#allocation8 + $0x4] sm:$0xf]  ;;  %v1776_v17 = vld [vmem:[#allocation8 + $0x190] sm:$0xf]  ;;  %v2009_v18 = vld [vmem:[#allocation8 + $0x194] sm:$0xf0] }
  0x61   :  { %1046 = vmatpush.bf16.msra.mxu2 %v1753_v61  ;;  %v1650_v22 = vld [vmem:[#allocation8 + $0x98] sm:$0xf0]  ;;  %v1768_v29 = vld [vmem:[#allocation8 + $0x180] sm:$0xf]  ;;  %v2020_v34 = vld [vmem:[#allocation8 + $0x1f4] sm:$0xf] }
  0x62   :  { %1060 = vmatpush.bf16.msra.mxu3 %v1817_v19  ;;  %v1976_v19 = vld [vmem:[#allocation8 + $0x94] sm:$0xf]  ;;  %v1826_v51 = vld [vmem:[#allocation8 + $0x1f8] sm:$0xf0]  ;;  %v1998_v52 = vld [vmem:[#allocation8 + $0x144] sm:$0xf] }
  0x63   :  { %1019 = vmatpush.bf16.msra.mxu0 %v1617_v24  ;;  %v1966_v24 = vld [vmem:[#allocation8 + $0x44] sm:$0xf]  ;;  %v1746_v38 = vld [vmem:[#allocation8 + $0x158] sm:$0xf0]  ;;  %v1738_v53 = vld [vmem:[#allocation8 + $0x148] sm:$0xf0] }
  0x64   :  { %1033 = vmatpush.bf16.msra.mxu1 %v1681_v27  ;;  %v1613_v27 = vor.u32 %v1966_v24, %v1610_v26  ;;  %v1653_v24 = vor.u32 %v1976_v19, %v1650_v22  ;;  %v1754_v26 = vld [vmem:[#allocation8 + $0x168] sm:$0xf0]  ;;  %v1714_v19 = vld [vmem:[#allocation8 + $0x118] sm:$0xf0] }
  0x65   :  { %1047 = vmatpush.bf16.msra.mxu2 %v1745_v13  ;;  %v2004_v13 = vld [vmem:[#allocation8 + $0x174] sm:$0xf] }
  0x66   :  { %1061 = vmatpush.bf16.msra.mxu3 %v1809_v31  ;;  %v1765_v16 = vor.u32 %v2004_v13, %v1762_v14  ;;  %v1974_v31 = vld [vmem:[#allocation8 + $0x84] sm:$0xf] }
  0x67   :  { %1020 = vmatpush.bf16.msra.mxu0 %v1609_v30  ;;  %v1984_v30 = vld [vmem:[#allocation8 + $0xd4] sm:$0xf] }
  0x68   :  { %1034 = vmatpush.bf16.msra.mxu1 %v1673_v33  ;;  %v1685_v33 = vor.u32 %v1984_v30, %v1682_v32  ;;  %v2007_v30 = vld [vmem:[#allocation8 + $0x184] sm:$0xf0] }
  0x69   :  { %1048 = vmatpush.bf16.msra.mxu2 %v1737_v25  ;;  %v2002_v25 = vld [vmem:[#allocation8 + $0x164] sm:$0xf]  ;;  %v1769_v32 = vor.u32 %v2007_v30, %v1768_v29 }
  0x6a   :  { %1062 = vmatpush.bf16.msra.mxu3 %v1801_v41  ;;  %v1757_v28 = vor.u32 %v2002_v25, %v1754_v26  ;;  %v1706_v25 = vld [vmem:[#allocation8 + $0x108] sm:$0xf0] }
  0x6b   :  { %1021 = vmatpush.bf16.msra.mxu0 %v1601_v35  ;;  %v1964_v35 = vld [vmem:[#allocation8 + $0x34] sm:$0xf] }
  0x6c   :  { %1035 = vmatpush.bf16.msra.mxu1 %v1665_v37  ;;  %v1605_v37 = vor.u32 %v1964_v35, %v1602_v36  ;;  %v176_v36 = vperm.slane %v2285_v49, 1 }
  0x6d   :  { %1049 = vmatpush.bf16.msra.mxu2 %v1729_v55  ;;  %v1829_v55 = vor.u32 %v2020_v34, %v1826_v51  ;;  %v2006_v34 = vld [vmem:[#allocation8 + $0x184] sm:$0xf]  ;;  %v1770_v51 = vld [vmem:[#allocation8 + $0x188] sm:$0xf0] }
  0x6e   :  { %1063 = vmatpush.bf16.msra.mxu3 %v1793_v56 }
  0x6f   :  { %1022 = vmatpush.bf16.msra.mxu0 %v1593_v40  ;;  %v1982_v40 = vld [vmem:[#allocation8 + $0xc4] sm:$0xf] }
  0x70   :  { %1036 = vmatpush.bf16.msra.mxu1 %v1657_v43  ;;  %v1677_v43 = vor.u32 %v1982_v40, %v1674_v42 }
  0x73   :  { %1023 = vmatpush.bf16.msra.mxu0 %v1585_v44  ;;  %v1720_v44 = vld [vmem:[#allocation8 + $0x120] sm:$0xf] }
  0x74   :  { %1037 = vmatpush.bf16.msra.mxu1 %v1649_v58  ;;  %v1712_v58 = vld [vmem:[#allocation8 + $0x110] sm:$0xf] }
  0x75   :  { %v1713_v61 = vor.u32 %v1993_v59, %v1712_v58  ;;  %v2016_v58 = vld [vmem:[#allocation8 + $0x1d4] sm:$0xf]  ;;  %v1810_v59 = vld [vmem:[#allocation8 + $0x1d8] sm:$0xf0] }
  0x77   :  { %1024 = vmatpush.bf16.msra.mxu0 %v1577_v47  ;;  %v1721_v47 = vor.u32 %v1995_v45, %v1720_v44  ;;  %v2018_v44 = vld [vmem:[#allocation8 + $0x1e4] sm:$0xf]  ;;  %v1818_v45 = vld [vmem:[#allocation8 + $0x1e8] sm:$0xf0] }
  0x78   :  { %1038 = vmatpush.bf16.msra.mxu1 %v1641_v5  ;;  %v1785_v5 = vor.u32 %v2011_v2, %v1784_v0  ;;  %v1821_v48 = vor.u32 %v2018_v44, %v1818_v45  ;;  %v1730_v0 = vld [vmem:[#allocation8 + $0x138] sm:$0xf0] }
  0x79   :  { %1050 = vmatpush.bf16.msra.mxu2 %v1721_v47 }
  0x7a   :  { %1064 = vmatpush.bf16.msra.mxu3 %v1785_v5 }
  0x7b   :  { %1073 = vmatpush.bf16.msrb.mxu0 %v1637_v57  ;;  %v1666_v57 = vld [vmem:[#allocation8 + $0xb8] sm:$0xf0] }
  0x7c   :  { %1087 = vmatpush.bf16.msrb.mxu1 %v1701_v9  ;;  %v1669_v60 = vor.u32 %v1980_v54, %v1666_v57  ;;  %v1991_v9 = vld [vmem:[#allocation8 + $0x104] sm:$0xf0]  ;;  %v1741_v57 = vor.u32 %v1998_v52, %v1738_v53 }
  0x7d   :  { %1051 = vmatpush.bf16.msra.mxu2 %v1713_v61  ;;  %v1705_v11 = vor.u32 %v1991_v9, %v1704_v8  ;;  %v1813_v61 = vor.u32 %v2016_v58, %v1810_v59  ;;  %v2029_v58 = vld [vmem:[#allocation10 + $0x38] sm:$0xff]  ;;  %v2028_v59 = vld [vmem:[#allocation10 + $0x30] sm:$0xff] }
  0x7f   :  { %1074 = vmatpush.bf16.msrb.mxu0 %v1629_v1  ;;  %v1589_v1 = vor.u32 %v1960_v62, %v1586_v63  ;;  %v1996_v63 = vld [vmem:[#allocation8 + $0x134] sm:$0xf] }
  0x80   :  { %1088 = vmatpush.bf16.msrb.mxu1 %v1693_v21  ;;  %v1777_v21 = vor.u32 %v2009_v18, %v1776_v17  ;;  %v1733_v3 = vor.u32 %v1996_v63, %v1730_v0  ;;  %v1992_v18 = vld [vmem:[#allocation8 + $0x114] sm:$0xf]  ;;  %v2037_v63 = vld [vmem:[#allocation10 + $0x78] sm:$0xff] }
  0x81   :  { %1052 = vmatpush.bf16.msra.mxu2 %v1705_v11  ;;  %v1994_v11 = vld [vmem:[#allocation8 + $0x124] sm:$0xf]  ;;  %v1717_v22 = vor.u32 %v1992_v18, %v1714_v19  ;;  %v2024_v0 = vld [vmem:[#allocation10 + $0x10] sm:$0xff] }
  0x82   :  { %1065 = vmatpush.bf16.msra.mxu3 %v1777_v21 }
  0x83   :  { %1075 = vmatpush.bf16.msrb.mxu0 %v1621_v15  ;;  %v1581_v15 = vor.u32 %v1958_v10, %v1578_v12  ;;  %v1722_v12 = vld [vmem:[#allocation8 + $0x128] sm:$0xf0] }
  0x84   :  { %1089 = vmatpush.bf16.msrb.mxu1 %v1685_v33  ;;  %v1642_v33 = vld [vmem:[#allocation8 + $0x88] sm:$0xf0]  ;;  %v1725_v13 = vor.u32 %v1994_v11, %v1722_v12  ;;  %v691_v11 = vld [vmem:[%s2307_s4] sm:$0x3] }
  0x85   :  { %1101 = vmatpush.bf16.msrb.mxu2 %v1765_v16  ;;  %v1645_v35 = vor.u32 %v1974_v31, %v1642_v33  ;;  %v1794_v16 = vld [vmem:[#allocation8 + $0x1b8] sm:$0xf0] }
  0x86   :  { %1066 = vmatpush.bf16.msra.mxu3 %v1769_v32  ;;  %v177_v32 = vperm.slane %v2285_v49, 2 }
  0x87   :  { %1076 = vmatpush.bf16.msrb.mxu0 %v1613_v27 }
  0x88   :  { %1090 = vmatpush.bf16.msrb.mxu1 %v1677_v43 }
  0x89   :  { %1102 = vmatpush.bf16.msrb.mxu2 %v1757_v28  ;;  %v1778_v28 = vld [vmem:[#allocation8 + $0x198] sm:$0xf0] }
  0x8a   :  { %1115 = vmatpush.bf16.msrb.mxu3 %v1829_v55 }
  0x8b   :  { %1077 = vmatpush.bf16.msrb.mxu0 %v1605_v37  ;;  %v2000_v37 = vld [vmem:[#allocation8 + $0x154] sm:$0xf] }
  0x8c   :  { %1091 = vmatpush.bf16.msrb.mxu1 %v1669_v60  ;;  %v1749_v41 = vor.u32 %v2000_v37, %v1746_v38  ;;  %v178_v37 = vperm.slane %v2285_v49, 3 }
  0x8e   :  { %1103 = vmatpush.bf16.msrb.mxu2 %v1749_v41  ;;  %1116 = vmatpush.bf16.msrb.mxu3 %v1821_v48 }
  0x8f   :  { %1078 = vmatpush.bf16.msrb.mxu0 %v1597_v50 }
  0x90   :  { %1092 = vmatpush.bf16.msrb.mxu1 %v1661_v6  ;;  %v2014_v6 = vld [vmem:[#allocation8 + $0x1c4] sm:$0xf] }
  0x92   :  { %1104 = vmatpush.bf16.msrb.mxu2 %v1741_v57  ;;  %1117 = vmatpush.bf16.msrb.mxu3 %v1813_v61  ;;  %v2026_v61 = vld [vmem:[#allocation10 + $0x20] sm:$0xff] }
  0x93   :  { %1079 = vmatpush.bf16.msrb.mxu0 %v1589_v1 }
  0x94   :  { %1093 = vmatpush.bf16.msrb.mxu1 %v1653_v24  ;;  %v1990_v24 = vld [vmem:[#allocation8 + $0x104] sm:$0xf] }
  0x95   :  { %v1709_v29 = vor.u32 %v1990_v24, %v1706_v25 }
  0x96   :  { %1105 = vmatpush.bf16.msrb.mxu2 %v1733_v3  ;;  %v2035_v3 = vld [vmem:[#allocation10 + $0x68] sm:$0xff] }
  0x97   :  { %1080 = vmatpush.bf16.msrb.mxu0 %v1581_v15  ;;  %v2012_v15 = vld [vmem:[#allocation8 + $0x1b4] sm:$0xf] }
  0x98   :  { %1094 = vmatpush.bf16.msrb.mxu1 %v1645_v35  ;;  %v1797_v17 = vor.u32 %v2012_v15, %v1794_v16  ;;  %v1773_v35 = vor.u32 %v2006_v34, %v1770_v51 }
  0x9a   :  { %1106 = vmatpush.bf16.msrb.mxu2 %v1725_v13  ;;  %v693_v13 = vperm.slane %v691_v11, 0 }
  0x9e   :  { %1107 = vmatpush.bf16.msrb.mxu2 %v1717_v22 }
  0xa2   :  { %1108 = vmatpush.bf16.msrb.mxu2 %v1709_v29 }
  0xb7   :  { %v512_v20 = vpop.f32.mrf.mxu0 }
  0xb8   :  { %v526_v23 = vpop.f32.mrf.mxu1  ;;  %v513_v27 = vadd.f32 %v512_v20, %v175_v7  ;;  %v2010_v20 = vld [vmem:[#allocation8 + $0x1a4] sm:$0xf] }
  0xba   :  { %v527_v39 = vadd.f32 %v526_v23, %v513_v27  ;;  %v1786_v23 = vld [vmem:[#allocation8 + $0x1a8] sm:$0xf0]  ;;  %v2008_v27 = vld [vmem:[#allocation8 + $0x194] sm:$0xf] }
  0xbb   :  { %v1789_v26 = vor.u32 %v2010_v20, %v1786_v23  ;;  %v1781_v30 = vor.u32 %v2008_v27, %v1778_v28 }
  0xbc   :  { %v615_v54 = vmax.f32 %v527_v39, 0.0 }
  0xbf   :  { %v540_v40 = vpop.f32.mrf.mxu2  ;;  %v514_v42 = vpop.f32.mrf.mxu0 }
  0xc0   :  { %v554_v43 = vpop.f32.mrf.mxu3  ;;  %v515_v46 = vadd.f32 %v514_v42, %v175_v7  ;;  %v528_v47 = vpop.f32.mrf.mxu1  ;;  %v541_v50 = vadd.f32 %v540_v40, %v176_v36  ;;  %v1802_v7 = vld [vmem:[#allocation8 + $0x1c8] sm:$0xf0] }
  0xc1   :  { %v1805_v8 = vor.u32 %v2014_v6, %v1802_v7  ;;  %v2033_v6 = vld [vmem:[#allocation10 + $0x58] sm:$0xff] }
  0xc2   :  { %v529_v56 = vadd.f32 %v528_v47, %v515_v46  ;;  %v555_v62 = vadd.f32 %v554_v43, %v541_v50 }
  0xc3   :  { %1118 = vmatpush.bf16.msrb.mxu3 %v1805_v8  ;;  %v2032_v8 = vld [vmem:[#allocation10 + $0x50] sm:$0xff] }
  0xc4   :  { %v619_v60 = vmax.f32 %v529_v56, 0.0  ;;  %v616_v9 = vmax.f32 %v555_v62, 0.0  ;;  %v2025_v62 = vld [vmem:[#allocation10 + $0x18] sm:$0xff] }
  0xc6   :  { %v623_v1 = vpack.c.bf16 %v619_v60, %v615_v54  ;;  %v2027_v60 = vld [vmem:[#allocation10 + $0x28] sm:$0xff] }
  0xc7   :  { %v542_v2 = vpop.f32.mrf.mxu2  ;;  %1119 = vmatpush.bf16.msrb.mxu3 %v1797_v17 }
  0xc8   :  { %v543_v4 = vadd.f32 %v542_v2, %v176_v36  ;;  %v556_v5 = vpop.f32.mrf.mxu3  ;;  %1025 = vmatmul.bf16.vlgmr.msra.gmra.mxu0 %v623_v1  ;;  %v2023_v2 = vld [vmem:[#allocation10 + $0x8] sm:$0xff] }
  0xc9   :  { %1267 = vmatpush.bf16.msra.mxu0 %v2029_v58 }
  0xca   :  { %v557_v10 = vadd.f32 %v556_v5, %v543_v4  ;;  %v2022_v4 = vld [vmem:[#allocation10] sm:$0xff] }
  0xcb   :  { %1120 = vmatpush.bf16.msrb.mxu3 %v1789_v26  ;;  %v2034_v5 = vld [vmem:[#allocation10 + $0x60] sm:$0xff] }
  0xcc   :  { %v620_v14 = vmax.f32 %v557_v10, 0.0  ;;  %v2031_v10 = vld [vmem:[#allocation10 + $0x48] sm:$0xff] }
  0xcd   :  { %1268 = vmatpush.bf16.msra.mxu0 %v2028_v59 }
  0xce   :  { %v624_v21 = vpack.c.bf16 %v620_v14, %v616_v9  ;;  %v2030_v14 = vld [vmem:[#allocation10 + $0x40] sm:$0xff] }
  0xcf   :  { %1121 = vmatpush.bf16.msrb.mxu3 %v1781_v30 }
  0xd0   :  { %1039 = vmatmul.bf16.vlgmr.msra.gmra.mxu1 %v624_v21 }
  0xd1   :  { %1269 = vmatpush.bf16.msra.mxu0 %v2027_v60  ;;  %1281 = vmatpush.bf16.msra.mxu1 %v2037_v63 }
  0xd3   :  { %1122 = vmatpush.bf16.msrb.mxu3 %v1773_v35 }
  0xd5   :  { %1270 = vmatpush.bf16.msra.mxu0 %v2026_v61 }
  0xd7   :  { %v568_v31 = vpop.f32.mrf.mxu0 }
  0xd8   :  { %v582_v33 = vpop.f32.mrf.mxu1  ;;  %1081 = vmatmul.bf16.vlgmr.msrb.gmra.mxu0 %v623_v1  ;;  %v569_v55 = vadd.f32 %v568_v31, %v177_v32  ;;  %v2036_v1 = vld [vmem:[#allocation10 + $0x70] sm:$0xff] }
  0xd9   :  { %1271 = vmatpush.bf16.msra.mxu0 %v2025_v62  ;;  %1282 = vmatpush.bf16.msra.mxu1 %v2036_v1 }
  0xda   :  { %v583_v40 = vadd.f32 %v582_v33, %v569_v55  ;;  %v694_v33 = vperm.slane %v691_v11, 1 }
  0xdc   :  { %v617_v45 = vmax.f32 %v583_v40, 0.0 }
  0xdd   :  { %1272 = vmatpush.bf16.msra.mxu0 %v2024_v0  ;;  %1283 = vmatpush.bf16.msra.mxu1 %v2035_v3 }
  0xdf   :  { %v596_v36 = vpop.f32.mrf.mxu2  ;;  %v570_v39 = vpop.f32.mrf.mxu0 }
  0xe0   :  { %v610_v38 = vpop.f32.mrf.mxu3  ;;  %v571_v41 = vadd.f32 %v570_v39, %v177_v32  ;;  %v584_v42 = vpop.f32.mrf.mxu1  ;;  %1095 = vmatmul.bf16.vlgmr.msrb.gmra.mxu1 %v624_v21  ;;  %v597_v44 = vadd.f32 %v596_v36, %v178_v37 }
  0xe1   :  { %1273 = vmatpush.bf16.msra.mxu0 %v2023_v2  ;;  %1284 = vmatpush.bf16.msra.mxu1 %v2034_v5 }
  0xe2   :  { %v585_v43 = vadd.f32 %v584_v42, %v571_v41  ;;  %v611_v50 = vadd.f32 %v610_v38, %v597_v44 }
  0xe4   :  { %v621_v46 = vmax.f32 %v585_v43, 0.0  ;;  %v618_v56 = vmax.f32 %v611_v50, 0.0 }
  0xe5   :  { %1274 = vmatpush.bf16.msra.mxu0 %v2022_v4  ;;  %1285 = vmatpush.bf16.msra.mxu1 %v2033_v6 }
  0xe6   :  { %v625_v47 = vpack.c.bf16 %v621_v46, %v617_v45 }
  0xe7   :  { %v598_v48 = vpop.f32.mrf.mxu2 }
  0xe8   :  { %v599_v52 = vadd.f32 %v598_v48, %v178_v37  ;;  %v612_v53 = vpop.f32.mrf.mxu3  ;;  %1053 = vmatmul.bf16.vlgmr.msra.gmra.mxu2 %v625_v47 }
  0xe9   :  { %1286 = vmatpush.bf16.msra.mxu1 %v2032_v8 }
  0xea   :  { %v613_v54 = vadd.f32 %v612_v53, %v599_v52  ;;  %v2050_v52 = vld [vmem:[%s2309_s6] ss:$0 sm:$0xff] }
  0xec   :  { %v622_v57 = vmax.f32 %v613_v54, 0.0 }
  0xed   :  { %1287 = vmatpush.bf16.msra.mxu1 %v2031_v10 }
  0xee   :  { %v626_v49 = vpack.c.bf16 %v622_v57, %v618_v56 }
  0xf0   :  { %1067 = vmatmul.bf16.vlgmr.msra.gmra.mxu3 %v626_v49 }
  0xf1   :  { %1288 = vmatpush.bf16.msra.mxu1 %v2030_v14 }
  0xf8   :  { %1109 = vmatmul.bf16.vlgmr.msrb.gmra.mxu2 %v625_v47 }
 0x100   :  { %1123 = vmatmul.bf16.vlgmr.msrb.gmra.mxu3 %v626_v49 }
 0x145   :  { %v1026_v7 = vpop.f32.mrf.mxu0 }
 0x146   :  { %v1027_v17 = vadd.f32 %v1026_v7, %v693_v13 }
 0x14d   :  { %v1040_v9 = vpop.f32.mrf.mxu1  ;;  %v1028_v15 = vpop.f32.mrf.mxu0 }
 0x14e   :  { %v1041_v20 = vadd.f32 %v1040_v9, %v1027_v17  ;;  %v1029_v21 = vadd.f32 %v1028_v15, %v693_v13 }
 0x155   :  { %v1042_v16 = vpop.f32.mrf.mxu1  ;;  %v1082_v24 = vpop.f32.mrf.mxu0 }
 0x156   :  { %v1043_v22 = vadd.f32 %v1042_v16, %v1029_v21  ;;  %v1083_v55 = vadd.f32 %v1082_v24, %v694_v33 }
 0x15d   :  { %v1096_v27 = vpop.f32.mrf.mxu1  ;;  %v1084_v51 = vpop.f32.mrf.mxu0 }
 0x15e   :  { %v1097_v37 = vadd.f32 %v1096_v27, %v1083_v55  ;;  %v1085_v38 = vadd.f32 %v1084_v51, %v694_v33 }
 0x165   :  { %v1098_v36 = vpop.f32.mrf.mxu1 }
 0x166   :  { %v1099_v40 = vadd.f32 %v1098_v36, %v1085_v38 }
 0x16b   :  { %v1054_v12 = vpop.f32.mrf.mxu2 }
 0x16c   :  { %v1055_v23 = vadd.f32 %v1054_v12, %v1041_v20 }
 0x173   :  { %v1068_v18 = vpop.f32.mrf.mxu3  ;;  %v1056_v19 = vpop.f32.mrf.mxu2 }
 0x174   :  { %v1069_v25 = vadd.f32 %v1068_v18, %v1055_v23  ;;  %v1057_v26 = vadd.f32 %v1056_v19, %v1043_v22 }
 0x176   :  { %v1129_v31 = vmax.f32 %v1069_v25, 0.0 }
 0x17b   :  { %v1070_v28 = vpop.f32.mrf.mxu3  ;;  %v1110_v30 = vpop.f32.mrf.mxu2 }
 0x17c   :  { %v1071_v29 = vadd.f32 %v1070_v28, %v1057_v26  ;;  %v1111_v41 = vadd.f32 %v1110_v30, %v1097_v37 }
 0x17e   :  { %v1131_v32 = vmax.f32 %v1071_v29, 0.0 }
 0x180   :  { %v1133_v34 = vpack.c.bf16 %v1131_v32, %v1129_v31 }
 0x182   :  { %1275 = vmatmul.bf16.vlgmr.msra.gmra.mxu0 %v1133_v34 }
 0x183   :  { %v1124_v35 = vpop.f32.mrf.mxu3  ;;  %v1112_v39 = vpop.f32.mrf.mxu2 }
 0x184   :  { %v1125_v42 = vadd.f32 %v1124_v35, %v1111_v41  ;;  %v1113_v43 = vadd.f32 %v1112_v39, %v1099_v40 }
 0x186   :  { %v1130_v46 = vmax.f32 %v1125_v42, 0.0 }
 0x18b   :  { %v1126_v44 = vpop.f32.mrf.mxu3 }
 0x18c   :  { %v1127_v45 = vadd.f32 %v1126_v44, %v1113_v43 }
 0x18e   :  { %v1132_v47 = vmax.f32 %v1127_v45, 0.0 }
 0x190   :  { %v1134_v48 = vpack.c.bf16 %v1132_v47, %v1130_v46 }
 0x192   :  { %1289 = vmatmul.bf16.vlgmr.msra.gmra.mxu1 %v1134_v48 }
 0x1ff   :  { %v1276_v50 = vpop.f32.mrf.mxu0 }
 0x200   :  { %v1277_v53 = vadd.f32 %v2050_v52, %v1276_v50 }
 0x207   :  { %v1278_v57 = vpop.f32.mrf.mxu0 }
 0x208   :  { %v1279_v49 = vadd.f32 %v2050_v52, %v1278_v57 }
 0x20f   :  { %v1290_v54 = vpop.f32.mrf.mxu1 }
 0x210   :  { %v1291_v56 = vadd.f32 %v1290_v54, %v1277_v53 }
 0x212   :  { %1295 = vst [vmem:[#allocation11] sm:$0xff] %v1291_v56 }
 0x217   :  { %v1292_v58 = vpop.f32.mrf.mxu1 }
 0x218   :  { %v1293_v59 = vadd.f32 %v1292_v58, %v1279_v49 }
 0x21a   :  { %1296 = vst [vmem:[#allocation11 + $0x8] sm:$0xff] %v1293_v59 }
 0x21b   :  { %1309 = dma.vmem_to_hbm [thread:$0]  %s1302_s8, 256, %s1304_s11, [#allocation4], %s2207_s13, %s2207_s13, %s2208_s14  }
 0x21c   :  { %2201 = dma.done.wait [#allocation4], 256  }
 0x21d   :  { %2202 = vsyncadd [#allocation4], 4294967040 }
 0x21e   :  { %1314 = vsyncpa [#allocation3], 1 }
 0x21f   :  { %1315 = vsyncpa [#allocation6], 1 }
 0x220   :  { %1316 = vsyncpa [#allocation9], 1 }
 0x221   :  { %1317 = vsyncpa [#allocation4], 1 }

</bundles_post_ra>
